<compile_context>
chip_gen: v6e
topology: v6e:2x2x1
jax: 0.10.0
libtpu: 0.0.40
codegen_flags: <defaults>
</compile_context>

<pallas_src>
import functools

import jax
import jax.numpy as jnp
from jax.experimental import pallas as pl
from jax.experimental.pallas import tpu as pltpu


def _round_up(x, m):
    return (x + m - 1) // m * m


# ---------------------------------------------------------------------------
# Kernel 1: row-tiled linear  y = x @ W^T + b   (W^T, b resident in VMEM)
# ---------------------------------------------------------------------------
def _linear_kernel(x_ref, w_ref, b_ref, o_ref):
    # x_ref: (tm, Din); w_ref: (Din, Dout); b_ref: (1, Dout); o_ref: (tm, Dout)
    acc = jnp.dot(x_ref[...], w_ref[...], preferred_element_type=jnp.float32)
    acc = acc + b_ref[...].astype(jnp.float32)
    o_ref[...] = acc.astype(o_ref.dtype)


def _linear(x2, w_t, b, *, tm_max=256):
    """x2: (M, Din), w_t: (Din, Dout), b: (Dout,) -> (M, Dout)."""
    M, Din = x2.shape
    Dout = w_t.shape[1]
    tm = min(tm_max, _round_up(M, 8))
    Mp = _round_up(M, tm)
    if Mp != M:
        x2 = jnp.pad(x2, ((0, Mp - M), (0, 0)))
    b2 = b.reshape(1, Dout)

    out = pl.pallas_call(
        _linear_kernel,
        out_shape=jax.ShapeDtypeStruct((Mp, Dout), x2.dtype),
        grid_spec=pltpu.PrefetchScalarGridSpec(
            num_scalar_prefetch=0,
            grid=(Mp // tm,),
            in_specs=[
                pl.BlockSpec((tm, Din), lambda i: (i, 0)),     # activation rows
                pl.BlockSpec((Din, Dout), lambda i: (0, 0)),   # weights (resident)
                pl.BlockSpec((1, Dout), lambda i: (0, 0)),     # bias (resident)
            ],
            out_specs=pl.BlockSpec((tm, Dout), lambda i: (i, 0)),
        ),
        compiler_params=pltpu.CompilerParams(dimension_semantics=("parallel",)),
    )(x2, w_t, b2)
    return out[:M] if Mp != M else out


# ---------------------------------------------------------------------------
# Kernel 2: per-(batch*head) attention core.  Each grid step handles one
# q row-tile against the full K/V of that head; softmax is done fully
# in-kernel in f32.  Also emits pre-/post-softmax attention (Intermediates).
# ---------------------------------------------------------------------------
def _attn_kernel(q_ref, k_ref, v_ref, o_ref, pre_ref, post_ref, *,
                 scale, causal, nq_total, nkv_total):
    q = q_ref[0]                       # (tq, dh)
    k = k_ref[0]                       # (nkv, dh)
    v = v_ref[0]                       # (nkv, dh)

    dots = jnp.dot(q, k.T, preferred_element_type=jnp.float32) * scale
    pre_ref[0] = dots                  # pre-softmax attention (before masking)

    if causal:
        tq = dots.shape[0]
        q_idx = (jax.lax.broadcasted_iota(jnp.int32, dots.shape, 0)
                 + pl.program_id(1) * tq)
        k_idx = jax.lax.broadcasted_iota(jnp.int32, dots.shape, 1)
        allow = k_idx <= q_idx + (nkv_total - nq_total)
        dots = jnp.where(allow, dots, -jnp.finfo(jnp.float32).max)

    m = jnp.max(dots, axis=-1, keepdims=True)
    e = jnp.exp(dots - m)
    attn = e / jnp.sum(e, axis=-1, keepdims=True)
    post_ref[0] = attn                 # post-softmax attention

    out = jnp.dot(attn.astype(v.dtype), v, preferred_element_type=jnp.float32)
    o_ref[0] = out.astype(o_ref.dtype)


def _attention_core(qh, kh, vh, *, scale, causal, tq_max=256):
    """qh: (BH, Nq, dh), kh/vh: (BH, Nkv, dh) -> (out, pre, post)."""
    BH, Nq, dh = qh.shape
    Nkv = kh.shape[1]
    tq = min(tq_max, _round_up(Nq, 8))
    Nqp = _round_up(Nq, tq)
    if Nqp != Nq:
        qh = jnp.pad(qh, ((0, 0), (0, Nqp - Nq), (0, 0)))

    kernel = functools.partial(_attn_kernel, scale=scale, causal=causal,
                               nq_total=Nq, nkv_total=Nkv)
    out, pre, post = pl.pallas_call(
        kernel,
        out_shape=(
            jax.ShapeDtypeStruct((BH, Nqp, dh), qh.dtype),
            jax.ShapeDtypeStruct((BH, Nqp, Nkv), jnp.float32),
            jax.ShapeDtypeStruct((BH, Nqp, Nkv), jnp.float32),
        ),
        grid_spec=pltpu.PrefetchScalarGridSpec(
            num_scalar_prefetch=0,
            grid=(BH, Nqp // tq),
            in_specs=[
                pl.BlockSpec((1, tq, dh), lambda b, i: (b, i, 0)),    # q tile
                pl.BlockSpec((1, Nkv, dh), lambda b, i: (b, 0, 0)),   # full K of head
                pl.BlockSpec((1, Nkv, dh), lambda b, i: (b, 0, 0)),   # full V of head
            ],
            out_specs=(
                pl.BlockSpec((1, tq, dh), lambda b, i: (b, i, 0)),
                pl.BlockSpec((1, tq, Nkv), lambda b, i: (b, i, 0)),
                pl.BlockSpec((1, tq, Nkv), lambda b, i: (b, i, 0)),
            ),
        ),
        compiler_params=pltpu.CompilerParams(
            dimension_semantics=("parallel", "parallel")),
    )(qh, kh, vh)
    if Nqp != Nq:
        out, pre, post = out[:, :Nq], pre[:, :Nq], post[:, :Nq]
    return out, pre, post


# ---------------------------------------------------------------------------
# Full Attention forward (default-config path of the PyTorch module).
# ---------------------------------------------------------------------------
def attention_forward(x, params, *, heads, dim_head, causal=False):
    """x: (B, N, dim). Returns (y, (pre_softmax_attn, post_softmax_attn))."""
    # TODO(synk): optional module features (talking/collab heads, mem-kv,
    # sparse_topk/entmax15, value gating, rotary/sinusoidal emb, masks,
    # dropout>0, on_attn GLU head) are not implemented; default config only.
    B, N, dim = x.shape
    h, dh = heads, dim_head
    scale = dh ** -0.5
    M = B * N
    x2 = x.reshape(M, dim)

    # Fused QKV projection (no bias); concatenated weights -> lane-dense output.
    w_qkv_t = jnp.concatenate(
        [params["w_q"].T, params["w_k"].T, params["w_v"].T], axis=1)  # (dim, 3*h*dh)
    qkv = _linear(x2, w_qkv_t, jnp.zeros((3 * h * dh,), x.dtype))
    q2, k2, v2 = jnp.split(qkv, 3, axis=-1)

    def to_bh(t):  # (M, h*dh) -> (B*h, N, dh)     [wrapper-side layout plumbing]
        return t.reshape(B, N, h, dh).transpose(0, 2, 1, 3).reshape(B * h, N, dh)

    qh, kh, vh = map(to_bh, (q2, k2, v2))
    out_h, pre, post = _attention_core(qh, kh, vh, scale=scale, causal=causal)

    out2 = out_h.reshape(B, h, N, dh).transpose(0, 2, 1, 3).reshape(M, h * dh)
    y2 = _linear(out2, params["w_out"].T, params["b_out"])
    y = y2.reshape(B, N, dim)

    pre = pre.reshape(B, h, N, -1)
    post = post.reshape(B, h, N, -1)
    return y, (pre, post)


# ---------------------------------------------------------------------------
# Pure-JAX reference (mirrors torch forward with default config).
# ---------------------------------------------------------------------------
def _reference(x, params, *, heads, dim_head, causal=False):
    B, N, dim = x.shape
    h, dh = heads, dim_head
    scale = dh ** -0.5
    q = x @ params["w_q"].T
    k = x @ params["w_k"].T
    v = x @ params["w_v"].T
    sh = lambda t: t.reshape(B, N, h, dh).transpose(0, 2, 1, 3)
    q, k, v = sh(q), sh(k), sh(v)
    dots = jnp.einsum('bhid,bhjd->bhij', q, k) * scale
    pre = dots
    if causal:
        mask = jnp.tril(jnp.ones((N, N), bool))
        dots = jnp.where(mask, dots, -jnp.finfo(dots.dtype).max)
    attn = jax.nn.softmax(dots, axis=-1)
    out = jnp.einsum('bhij,bhjd->bhid', attn, v)
    out = out.transpose(0, 2, 1, 3).reshape(B, N, h * dh)
    y = out @ params["w_out"].T + params["b_out"]
    return y, pre, attn


if __name__ == "__main__":
    B, N, dim = 2, 8, 32
    heads, dim_head = 2, 16
    inner = heads * dim_head

    key = jax.random.PRNGKey(0)
    kx, kq, kk, kv, kw, kb = jax.random.split(key, 6)
    x = jax.random.normal(kx, (B, N, dim), jnp.float32)

    # Deterministic PyTorch-style Linear init U(-1/sqrt(fan_in), 1/sqrt(fan_in)).
    bound_in = 1.0 / (dim ** 0.5)
    bound_out = 1.0 / (inner ** 0.5)
    params = {
        "w_q": jax.random.uniform(kq, (inner, dim), jnp.float32, -bound_in, bound_in),
        "w_k": jax.random.uniform(kk, (inner, dim), jnp.float32, -bound_in, bound_in),
        "w_v": jax.random.uniform(kv, (inner, dim), jnp.float32, -bound_in, bound_in),
        "w_out": jax.random.uniform(kw, (dim, inner), jnp.float32, -bound_out, bound_out),
        "b_out": jax.random.uniform(kb, (dim,), jnp.float32, -bound_out, bound_out),
    }

    y, (pre, post) = attention_forward(x, params, heads=heads, dim_head=dim_head)
    y = jax.block_until_ready(y)

    y_ref, pre_ref, post_ref = _reference(x, params, heads=heads, dim_head=dim_head)

    assert y.shape == (B, N, dim)
    assert jnp.allclose(y, y_ref, atol=2e-4, rtol=2e-4)
    assert jnp.allclose(pre, pre_ref, atol=2e-4, rtol=2e-4)
    assert jnp.allclose(post, post_ref, atol=2e-4, rtol=2e-4)

    print("KERNEL_OK")
</pallas_src>

<mosaic_0001>
module attributes {stable_mosaic.version = 11 : i64} {
  func.func @_linear_kernel(%arg0: i32, %arg1: memref<16x32xf32, #tpu.memory_space<vmem>>, %arg2: memref<32x96xf32, #tpu.memory_space<vmem>>, %arg3: memref<1x96xf32, #tpu.memory_space<vmem>>, %arg4: memref<16x96xf32, #tpu.memory_space<vmem>>) attributes {dimension_semantics = [#tpu.dimension_semantics<parallel>], iteration_bounds = array<i64: 1>, scalar_prefetch = 0 : i64, scratch_operands = 0 : i64, tpu.core_type = #tpu.core_type<tc>, window_params = [{transform_indices = @transform_0, window_bounds = array<i64: 16, 32>}, {pipeline_mode = #tpu.pipeline_mode<synchronous>, transform_indices = @transform_1, window_bounds = array<i64: 32, 96>}, {pipeline_mode = #tpu.pipeline_mode<synchronous>, transform_indices = @transform_2, window_bounds = array<i64: 1, 96>}, {transform_indices = @transform_3, window_bounds = array<i64: 16, 96>}]} {
    %c0 = arith.constant 0 : index
    %c0_0 = arith.constant 0 : index
    %0 = vector.load %arg1[%c0, %c0_0] : memref<16x32xf32, #tpu.memory_space<vmem>>, vector<16x32xf32>
    %c0_1 = arith.constant 0 : index
    %c0_2 = arith.constant 0 : index
    %1 = vector.load %arg2[%c0_1, %c0_2] : memref<32x96xf32, #tpu.memory_space<vmem>>, vector<32x96xf32>
    %cst = arith.constant dense<0.000000e+00> : vector<16x96xf32>
    %2 = tpu.matmul %0, %1, %cst {dimension_numbers = #tpu.dot_dimension_numbers<[1], [0], [0], [1], [0, 0, 1, 1], [], []>} : vector<16x32xf32>, vector<32x96xf32>, vector<16x96xf32> -> vector<16x96xf32>
    %c0_3 = arith.constant 0 : index
    %c0_4 = arith.constant 0 : index
    %3 = vector.load %arg3[%c0_3, %c0_4] : memref<1x96xf32, #tpu.memory_space<vmem>>, vector<1x96xf32>
    %4 = vector.broadcast %3 : vector<1x96xf32> to vector<16x96xf32>
    %5 = arith.addf %2, %4 : vector<16x96xf32>
    %c0_5 = arith.constant 0 : index
    %c0_6 = arith.constant 0 : index
    %6 = vector.load %arg4[%c0_5, %c0_6] : memref<16x96xf32, #tpu.memory_space<vmem>>, vector<16x96xf32>
    tpu.vector_store %arg4[%c0_5, %c0_6], %5 {strides = array<i32>} : memref<16x96xf32, #tpu.memory_space<vmem>>, vector<16x96xf32>,
    return
  }
  func.func @transform_0(%arg0: i32) -> (i32, i32) {
    %c0_i32 = arith.constant 0 : i32
    %c0_i32_0 = arith.constant 0 : i32
    return %arg0, %c0_i32 : i32, i32
  }
  func.func @transform_1(%arg0: i32) -> (i32, i32) {
    %c0_i32 = arith.constant 0 : i32
    %c0_i32_0 = arith.constant 0 : i32
    %c0_i32_1 = arith.constant 0 : i32
    return %c0_i32, %c0_i32_0 : i32, i32
  }
  func.func @transform_2(%arg0: i32) -> (i32, i32) {
    %c0_i32 = arith.constant 0 : i32
    %c0_i32_0 = arith.constant 0 : i32
    %c0_i32_1 = arith.constant 0 : i32
    return %c0_i32, %c0_i32_0 : i32, i32
  }
  func.func @transform_3(%arg0: i32) -> (i32, i32) {
    %c0_i32 = arith.constant 0 : i32
    %c0_i32_0 = arith.constant 0 : i32
    return %arg0, %c0_i32 : i32, i32
  }
}

</mosaic_0001>

<bundles_post_ra>
// kernel: tpu_custom_call.1
= control target key start
LH: loop header
LB: loop body
LE: loop exit
PB: predicated region body
PF: predicated region fallthrough
CT: control target
= control target key end

     0   :  { %8 = vsyncpa [#allocation3], 0  ;;  %s298_s0 = inlined_call_operand.hbm [shape: f32[16,32], index: 0, kind: input, shape index: {}]   ;;  %s299_s1 = inlined_call_operand.hbm [shape: f32[32,96], index: 1, kind: input, shape index: {}]   ;;  %s300_s2 = inlined_call_operand.vmem [shape: f32[1,96], index: 2, kind: input, shape index: {}]   ;;  %s301_s3 = inlined_call_operand.hbm [shape: f32[16,96], index: 3, kind: output, shape index: {}]  }
   0x1   :  { %9 = vsyncpa [#allocation6], 0 }
   0x2   :  { %10 = vsyncpa [#allocation4], 0  ;;  %s250_s12 = smov [#allocation2]  }
   0x3   :  { %s16_s13 = sshll.u32 %s250_s12, 4  ;;  %s17_s13 = int_to_ptr.vmem [resolvable:$true] %s16_s13 }
   0x4   :  { %s192_s14 = scalar_lea.vmem %s17_s13, 256  ;;  %p197_p1 = scmp.lt.s32.totalorder %s17_s13, %s17_s13 }
   0x5   :  { %p193_p0 = scmp.ne.s32.totalorder %s17_s13, %s192_s14  ;;  %p198_p2 = scmp.lt.s32.totalorder %s192_s14, %s192_s14 }
   0x7   :  { %p199_p3 = por %p198_p2, %p197_p1 }
   0x9   :  { %p200_p4 = pnand %p199_p3, %p193_p0 }
   0xb   :  { %203 = shalt.err (!%p200_p4)
}
   0xc   :  { %s251_s15 = smov 128   ;;  %s252_s16 = smov 8  }
   0xd   :  { %22 = dma.hbm_to_vmem [thread:$0]  %s298_s0, 256, %s17_s13, [#allocation3], %s251_s15, %s251_s15, %s252_s16  }
   0xe   :  { %s253_s19 = smov [#allocation5]  }
   0xf   :  { %s28_s20 = sshll.u32 %s253_s19, 4  ;;  %s29_s20 = int_to_ptr.vmem [resolvable:$true] %s28_s20 }
  0x10   :  { %s212_s21 = scalar_lea.vmem %s29_s20, 512  ;;  %p217_p6 = scmp.lt.s32.totalorder %s29_s20, %s29_s20 }
  0x11   :  { %p213_p5 = scmp.ne.s32.totalorder %s29_s20, %s212_s21  ;;  %p218_p7 = scmp.lt.s32.totalorder %s212_s21, %s212_s21 }
  0x13   :  { %p219_p8 = por %p218_p7, %p217_p6 }
  0x15   :  { %p220_p9 = pnand %p219_p8, %p213_p5 }
  0x17   :  { %223 = shalt.err (!%p220_p9)
}
  0x18   :  { %34 = dma.hbm_to_vmem [thread:$0]  %s299_s1, 512, %s29_s20, [#allocation6], %s251_s15, %s251_s15, %s252_s16  }
  0x19   :  { %244 = dma.done.wait [#allocation3], 256  }
  0x1a   :  { %245 = vsyncadd [#allocation3], 4294967040 }
  0x1b   :  { %246 = dma.done.wait [#allocation6], 512  }
  0x1c   :  { %247 = vsyncadd [#allocation6], 4294966784  ;;  %vm56_vm0 = vcmask 261120   ;;  %v48_v0 = vld [vmem:[#allocation5 + $0x18] sm:$0xff]  ;;  %v47_v1 = vld [vmem:[#allocation5 + $0x10] sm:$0xff]  ;;  %vm138_vm1 = vcmask 785408  }
  0x1d   :  { %168 = vmatprep.subr.mxu0 %v48_v0  ;;  %v43_v2 = vld [vmem:[#allocation2] sm:$0xff]  ;;  %v46_v3 = vld [vmem:[#allocation5 + $0x8] sm:$0xff]  ;;  %v45_v4 = vld [vmem:[#allocation5] sm:$0xff]  ;;  %s254_s24 = smov [#allocation7]  }
  0x1e   :  { %169 = vmatpush3.msra.mxu0 %v48_v0  ;;  %176 = vmatprep.mubr.msk.f32.mxu0 %vm56_vm0, %v43_v2  ;;  %v44_v5 = vld [vmem:[#allocation2 + $0x8] sm:$0xff]  ;;  %v159_v6 = vld [vmem:[%s300_s2] ss:$0 sm:$0xff]  ;;  %s146_s25 = sshll.u32 %s254_s24, 4  ;;  %s147_s25 = int_to_ptr.vmem [resolvable:$true] %s146_s25 }
  0x1f   :  { %170 = vmatprep.subr.mxu0 %v47_v1  ;;  %s224_s26 = scalar_lea.vmem %s147_s25, 256  ;;  %p229_p11 = scmp.lt.s32.totalorder %s147_s25, %s147_s25 }
  0x20   :  { %171 = vmatpush3.msra.mxu0 %v47_v1  ;;  %p225_p10 = scmp.ne.s32.totalorder %s147_s25, %s224_s26  ;;  %p230_p12 = scmp.lt.s32.totalorder %s224_s26, %s224_s26 }
  0x21   :  { %172 = vmatprep.subr.mxu0 %v46_v3 }
  0x22   :  { %173 = vmatpush3.msra.mxu0 %v46_v3  ;;  %p231_p13 = por %p230_p12, %p229_p11 }
  0x23   :  { %174 = vmatprep.subr.mxu0 %v45_v4 }
  0x24   :  { %175 = vmatpush3.msra.mxu0 %v45_v4  ;;  %p232_p0 = pnand %p231_p13, %p225_p10 }
  0x25   :  { %177 = vmatmul.mubr.msk.f32.vlgmr.msra.gmra.mxu0 %vm56_vm0, %v44_v5 }
  0xe5   :  { %v178_v7 = vpop.f32.mrf.mxu0 }
  0xe6   :  { %v135_v8 = vadd.f32 %v178_v7, %v159_v6 }
  0xe7   :  { %v129_v9 = vpop.f32.mrf.mxu0 }
  0xe8   :  { %v130_v10 = vadd.f32 %v159_v6, %v129_v9  ;;  %140 = vst.msk [vmem:[#allocation7 + $0x8] sm:$0xff] %vm138_vm1, %v135_v8 }
  0xea   :  { %139 = vst.msk [vmem:[#allocation7] sm:$0xff] %vm138_vm1, %v130_v10 }
  0xeb   :  { %235 = shalt.err (!%p232_p0)
}
  0xec   :  { %152 = dma.vmem_to_hbm [thread:$0]  %s147_s25, 256, %s301_s3, [#allocation4], %s251_s15, %s251_s15, %s252_s16  }
  0xed   :  { %248 = dma.done.wait [#allocation4], 256  }
  0xee   :  { %249 = vsyncadd [#allocation4], 4294967040 }
  0xef   :  { %156 = vsyncpa [#allocation3], 1 }
  0xf0   :  { %157 = vsyncpa [#allocation6], 1 }
  0xf1   :  { %158 = vsyncpa [#allocation4], 1 }

</bundles_post_ra>
